<compile_context>
chip_gen: v7x
topology: tpu7x:2x2x1
jax: 0.10.0
libtpu: 0.0.40
codegen_flags: <defaults>
</compile_context>

<pallas_src>
import functools

import jax
import jax.numpy as jnp
from jax import lax
from jax.experimental import pallas as pl
from jax.experimental.pallas import tpu as pltpu

_LANE = 128     # lane width (last dim of a vreg)
_SUBLANE = 8    # f32 sublane packing (second-to-last dim)
_HP = lax.Precision.HIGHEST


def _round_up(x, m):
    return ((x + m - 1) // m) * m


def _policy_kernel(obs_ref,
                   w1_ref, b1_ref,
                   w2_ref, b2_ref,
                   wa_ref, ba_ref,
                   act_ref):
    """Fused MLP-extractor (policy branch) + action_net for one batch tile.

    obs_ref : (TB, F)        -- batch tile (double-buffered / pipelined)
    w*_ref  : full weights   -- constant index_map, single-buffered, VMEM-resident
    act_ref : (TB, ACT_PAD)  -- lane-dense (128-multiple) output tile
    """
    x = obs_ref[...]                                                       # (TB, F)

    # mlp_extractor.policy_net layer 0: Linear + Tanh
    h = jnp.tanh(jnp.dot(x, w1_ref[...], precision=_HP,
                         preferred_element_type=jnp.float32) + b1_ref[...])   # (TB, H)

    # mlp_extractor.policy_net layer 1: Linear + Tanh
    h = jnp.tanh(jnp.dot(h, w2_ref[...], precision=_HP,
                         preferred_element_type=jnp.float32) + b2_ref[...])   # (TB, H)

    # action_net: Linear (output width padded to a multiple of 128 lanes)
    act_ref[...] = (jnp.dot(h, wa_ref[...], precision=_HP,
                            preferred_element_type=jnp.float32)
                    + ba_ref[...]).astype(act_ref.dtype)                      # (TB, ACT_PAD)

    # TODO(synk): value_hidden (mlp_extractor.value_net branch) is computed by the
    # PyTorch module but never used by forward()'s return; intentionally omitted here.


@functools.partial(
    jax.jit,
    static_argnames=("act_dim", "block_b", "core_parallel", "xla_fallback_max_batch"),
)
def onnxable_policy_forward(obs, state_ins, params, *, act_dim,
                            block_b=1024, core_parallel=False,
                            xla_fallback_max_batch=0):
    """obs: (B, obs_dim) float32 (already-flat observation array, use_obs_array=True).

    `params` must come from prepare_params() (action head pre-padded to 128 lanes).
    """
    B, F = obs.shape
    H = params["w1"].shape[1]
    act_pad = params["wa"].shape[1]          # already lane-padded by prepare_params()

    # --- tiny-batch escape hatch: three 16/32-wide matmuls are below the
    #     pallas_call custom-call + grid-priming floor; plain XLA fusion wins there.
    if B <= xla_fallback_max_batch:
        h = jnp.tanh(jnp.dot(obs, params["w1"], precision=_HP) + params["b1"])
        h = jnp.tanh(jnp.dot(h, params["w2"], precision=_HP) + params["b2"])
        act = jnp.dot(h, params["wa"], precision=_HP) + params["ba"]
        return act[:, :act_dim], state_ins

    # --- balanced, sublane-dense batch tiling (waste capped at <8 rows per tile) ---
    b8 = _round_up(B, _SUBLANE)
    n_tiles = max(1, -(-b8 // block_b))                  # grid steps
    tb = _round_up(-(-b8 // n_tiles), _SUBLANE)          # balanced tile, multiple of 8
    b_pad = tb * n_tiles
    obs_p = jnp.pad(obs, ((0, b_pad - B), (0, 0))) if b_pad != B else obs
    grid = (n_tiles,)

    # --- VMEM budget: double-buffered obs/out tiles + single-buffered weights ---
    f32 = 4
    weight_bytes = (F * H + H + H * H + H + H * act_pad + act_pad) * f32
    tile_bytes = (tb * F + tb * act_pad) * f32
    vmem_limit = int((weight_bytes + 2 * tile_bytes) * 1.5) + (2 << 20)
    vmem_limit = min(max(vmem_limit, 4 << 20), 32 << 20)   # <= 32 MiB: headroom on v7x

    # --- advisory cost hint for the XLA scheduler ---
    cost = pl.CostEstimate(
        flops=2 * b_pad * (F * H + H * H + H * act_pad),
        transcendentals=2 * b_pad * H,
        bytes_accessed=f32 * (b_pad * F + b_pad * act_pad) + weight_bytes,
    )

    # Batch axis semantics: CORE_PARALLEL engages v7x's 2nd TensorCore when the grid
    # has >= 2 blocks; plain "parallel" is the verified default (no-op on v5e/v6e).
    dims = (pltpu.CORE_PARALLEL,) if core_parallel else ("parallel",)

    def _pinned(shape):
        # Constant index_map => weight stays VMEM-resident; single buffer is enough.
        return pl.BlockSpec(shape, lambda i: (0, 0),
                            pipeline_mode=pl.Buffered(buffer_count=1))

    out = pl.pallas_call(
        _policy_kernel,
        out_shape=jax.ShapeDtypeStruct((b_pad, act_pad), jnp.float32),
        grid=grid,
        in_specs=[
            pl.BlockSpec((tb, F), lambda i: (i, 0)),      # obs tile: pipelined
            _pinned((F, H)),                              # w1
            _pinned((1, H)),                              # b1
            _pinned((H, H)),                              # w2
            _pinned((1, H)),                              # b2
            _pinned((H, act_pad)),                        # wa (lane-padded)
            _pinned((1, act_pad)),                        # ba (lane-padded)
        ],
        out_specs=pl.BlockSpec((tb, act_pad), lambda i: (i, 0)),
        compiler_params=pltpu.CompilerParams(
            dimension_semantics=dims,
            vmem_limit_bytes=vmem_limit,
        ),
        cost_estimate=cost,
    )(obs_p, params["w1"], params["b1"], params["w2"], params["b2"],
      params["wa"], params["ba"])

    # Strip batch / lane padding; forward() returns (action_net(action_hidden), state_ins)
    action = out[:B, :act_dim]
    return action, state_ins


def make_params(key, obs_dim, hidden_dim, act_dim):
    """Deterministic synthetic parameters (shapes follow SB3 MlpExtractor + action_net).

    Weights are stored pre-transposed as (in_dim, out_dim), i.e. y = x @ W + b.
    """
    ks = jax.random.split(key, 6)
    scale = 0.1
    return {
        # policy-net layer 0: Linear(obs_dim -> hidden_dim)
        "w1": scale * jax.random.normal(ks[0], (obs_dim, hidden_dim), jnp.float32),
        "b1": scale * jax.random.normal(ks[1], (1, hidden_dim), jnp.float32),
        # policy-net layer 1: Linear(hidden_dim -> hidden_dim)
        "w2": scale * jax.random.normal(ks[2], (hidden_dim, hidden_dim), jnp.float32),
        "b2": scale * jax.random.normal(ks[3], (1, hidden_dim), jnp.float32),
        # action_net: Linear(hidden_dim -> act_dim)
        "wa": scale * jax.random.normal(ks[4], (hidden_dim, act_dim), jnp.float32),
        "ba": scale * jax.random.normal(ks[5], (1, act_dim), jnp.float32),
    }


def prepare_params(raw_params):
    """One-time (outside jit): zero-pad the action head to a 128-lane multiple.

    Returns (prepared_params, act_dim).  Doing this once removes two pad ops +
    HBM round trips from every forward() invocation.
    """
    act_dim = raw_params["wa"].shape[1]
    act_pad = _round_up(act_dim, _LANE)
    prepared = dict(raw_params)
    prepared["wa"] = jnp.pad(raw_params["wa"], ((0, 0), (0, act_pad - act_dim)))
    prepared["ba"] = jnp.pad(raw_params["ba"], ((0, 0), (0, act_pad - act_dim)))
    return prepared, act_dim


def _reference(obs, raw_params):
    h = jnp.tanh(jnp.dot(obs, raw_params["w1"], precision=_HP) + raw_params["b1"])
    h = jnp.tanh(jnp.dot(h, raw_params["w2"], precision=_HP) + raw_params["b2"])
    return jnp.dot(h, raw_params["wa"], precision=_HP) + raw_params["ba"]


if __name__ == "__main__":
    OBS_DIM, HIDDEN, ACT_DIM = 16, 32, 4

    key = jax.random.PRNGKey(0)
    k_obs, k_params, k_mid, k_big = jax.random.split(key, 4)
    raw = make_params(k_params, OBS_DIM, HIDDEN, ACT_DIM)
    params, act_dim = prepare_params(raw)

    # --- small-batch path (matches the module's typical ONNX inference shape) ---
    B = 2
    obs = jax.random.normal(k_obs, (B, OBS_DIM), jnp.float32)
    state_ins = jnp.zeros((B, 1), jnp.float32)   # RNN state pass-through (unused by policy)

    action, state_out = onnxable_policy_forward(obs, state_ins, params, act_dim=act_dim)
    jax.block_until_ready(action)
    jax.block_until_ready(state_out)

    ref = _reference(obs, raw)
    assert jnp.allclose(action, ref, atol=1e-5, rtol=1e-5), "mismatch vs reference (small batch)"
    assert action.shape == (B, ACT_DIM)
    assert state_out.shape == state_ins.shape

    # --- uneven batch: exercises balanced tiling (300 -> 304 rows, single grid step) ---
    BM = 300
    obs_m = jax.random.normal(k_mid, (BM, OBS_DIM), jnp.float32)
    state_m = jnp.zeros((BM, 1), jnp.float32)
    action_m, _ = onnxable_policy_forward(obs_m, state_m, params, act_dim=act_dim)
    jax.block_until_ready(action_m)
    assert jnp.allclose(action_m, _reference(obs_m, raw), atol=1e-5, rtol=1e-5), \
        "mismatch vs reference (uneven batch)"
    assert action_m.shape == (BM, ACT_DIM)

    # --- large-batch path (exercises the 2-step batch grid with block_b=1024) ---
    BL = 2048
    obs_l = jax.random.normal(k_big, (BL, OBS_DIM), jnp.float32)
    state_l = jnp.zeros((BL, 1), jnp.float32)
    action_l, _ = onnxable_policy_forward(obs_l, state_l, params, act_dim=act_dim)
    jax.block_until_ready(action_l)
    assert jnp.allclose(action_l, _reference(obs_l, raw), atol=1e-5, rtol=1e-5), \
        "mismatch vs reference (large batch)"
    assert action_l.shape == (BL, ACT_DIM)

    print("KERNEL_OK")
</pallas_src>

<mosaic_0001>
module attributes {stable_mosaic.version = 11 : i64} {
  func.func @_policy_kernel(%arg0: i32, %arg1: memref<8x16xf32, #tpu.memory_space<vmem>>, %arg2: memref<16x32xf32, #tpu.memory_space<vmem>>, %arg3: memref<1x32xf32, #tpu.memory_space<vmem>>, %arg4: memref<32x32xf32, #tpu.memory_space<vmem>>, %arg5: memref<1x32xf32, #tpu.memory_space<vmem>>, %arg6: memref<32x128xf32, #tpu.memory_space<vmem>>, %arg7: memref<1x128xf32, #tpu.memory_space<vmem>>, %arg8: memref<8x128xf32, #tpu.memory_space<vmem>>) attributes {dimension_semantics = [#tpu.dimension_semantics<parallel>], iteration_bounds = array<i64: 1>, scalar_prefetch = 0 : i64, scratch_operands = 0 : i64, tpu.core_type = #tpu.core_type<tc>, window_params = [{transform_indices = @transform_0, window_bounds = array<i64: 8, 16>}, {pipeline_mode = #tpu.pipeline_mode<synchronous>, transform_indices = @transform_1, window_bounds = array<i64: 16, 32>}, {pipeline_mode = #tpu.pipeline_mode<synchronous>, transform_indices = @transform_2, window_bounds = array<i64: 1, 32>}, {pipeline_mode = #tpu.pipeline_mode<synchronous>, transform_indices = @transform_3, window_bounds = array<i64: 32, 32>}, {pipeline_mode = #tpu.pipeline_mode<synchronous>, transform_indices = @transform_4, window_bounds = array<i64: 1, 32>}, {pipeline_mode = #tpu.pipeline_mode<synchronous>, transform_indices = @transform_5, window_bounds = array<i64: 32, 128>}, {pipeline_mode = #tpu.pipeline_mode<synchronous>, transform_indices = @transform_6, window_bounds = array<i64: 1, 128>}, {transform_indices = @transform_7, window_bounds = array<i64: 8, 128>}]} {
    %c0 = arith.constant 0 : index
    %c0_0 = arith.constant 0 : index
    %0 = vector.load %arg1[%c0, %c0_0] : memref<8x16xf32, #tpu.memory_space<vmem>>, vector<8x16xf32>
    %c0_1 = arith.constant 0 : index
    %c0_2 = arith.constant 0 : index
    %1 = vector.load %arg2[%c0_1, %c0_2] : memref<16x32xf32, #tpu.memory_space<vmem>>, vector<16x32xf32>
    %cst = arith.constant dense<0.000000e+00> : vector<8x32xf32>
    %2 = tpu.matmul %0, %1, %cst {dimension_numbers = #tpu.dot_dimension_numbers<[1], [0], [0], [1], [0, 0, 1, 1], [], []>, precision = #tpu.contract_precision<fp32>} : vector<8x16xf32>, vector<16x32xf32>, vector<8x32xf32> -> vector<8x32xf32>
    %c0_3 = arith.constant 0 : index
    %c0_4 = arith.constant 0 : index
    %3 = vector.load %arg3[%c0_3, %c0_4] : memref<1x32xf32, #tpu.memory_space<vmem>>, vector<1x32xf32>
    %4 = vector.broadcast %3 : vector<1x32xf32> to vector<8x32xf32>
    %5 = arith.addf %2, %4 : vector<8x32xf32>
    %6 = math.tanh %5 : vector<8x32xf32>
    %c0_5 = arith.constant 0 : index
    %c0_6 = arith.constant 0 : index
    %7 = vector.load %arg4[%c0_5, %c0_6] : memref<32x32xf32, #tpu.memory_space<vmem>>, vector<32x32xf32>
    %cst_7 = arith.constant dense<0.000000e+00> : vector<8x32xf32>
    %8 = tpu.matmul %6, %7, %cst_7 {dimension_numbers = #tpu.dot_dimension_numbers<[1], [0], [0], [1], [0, 0, 1, 1], [], []>, precision = #tpu.contract_precision<fp32>} : vector<8x32xf32>, vector<32x32xf32>, vector<8x32xf32> -> vector<8x32xf32>
    %c0_8 = arith.constant 0 : index
    %c0_9 = arith.constant 0 : index
    %9 = vector.load %arg5[%c0_8, %c0_9] : memref<1x32xf32, #tpu.memory_space<vmem>>, vector<1x32xf32>
    %10 = vector.broadcast %9 : vector<1x32xf32> to vector<8x32xf32>
    %11 = arith.addf %8, %10 : vector<8x32xf32>
    %12 = math.tanh %11 : vector<8x32xf32>
    %c0_10 = arith.constant 0 : index
    %c0_11 = arith.constant 0 : index
    %13 = vector.load %arg6[%c0_10, %c0_11] : memref<32x128xf32, #tpu.memory_space<vmem>>, vector<32x128xf32>
    %cst_12 = arith.constant dense<0.000000e+00> : vector<8x128xf32>
    %14 = tpu.matmul %12, %13, %cst_12 {dimension_numbers = #tpu.dot_dimension_numbers<[1], [0], [0], [1], [0, 0, 1, 1], [], []>, precision = #tpu.contract_precision<fp32>} : vector<8x32xf32>, vector<32x128xf32>, vector<8x128xf32> -> vector<8x128xf32>
    %c0_13 = arith.constant 0 : index
    %c0_14 = arith.constant 0 : index
    %15 = vector.load %arg7[%c0_13, %c0_14] : memref<1x128xf32, #tpu.memory_space<vmem>>, vector<1x128xf32>
    %16 = vector.broadcast %15 : vector<1x128xf32> to vector<8x128xf32>
    %17 = arith.addf %14, %16 : vector<8x128xf32>
    %c0_15 = arith.constant 0 : index
    %c0_16 = arith.constant 0 : index
    %18 = vector.load %arg8[%c0_15, %c0_16] : memref<8x128xf32, #tpu.memory_space<vmem>>, vector<8x128xf32>
    tpu.vector_store %arg8[%c0_15, %c0_16], %17 {strides = array<i32>} : memref<8x128xf32, #tpu.memory_space<vmem>>, vector<8x128xf32>,
    return
  }
  func.func @transform_0(%arg0: i32) -> (i32, i32) {
    %c0_i32 = arith.constant 0 : i32
    %c0_i32_0 = arith.constant 0 : i32
    return %arg0, %c0_i32 : i32, i32
  }
  func.func @transform_1(%arg0: i32) -> (i32, i32) {
    %c0_i32 = arith.constant 0 : i32
    %c0_i32_0 = arith.constant 0 : i32
    %c0_i32_1 = arith.constant 0 : i32
    return %c0_i32, %c0_i32_0 : i32, i32
  }
  func.func @transform_2(%arg0: i32) -> (i32, i32) {
    %c0_i32 = arith.constant 0 : i32
    %c0_i32_0 = arith.constant 0 : i32
    %c0_i32_1 = arith.constant 0 : i32
    return %c0_i32, %c0_i32_0 : i32, i32
  }
  func.func @transform_3(%arg0: i32) -> (i32, i32) {
    %c0_i32 = arith.constant 0 : i32
    %c0_i32_0 = arith.constant 0 : i32
    %c0_i32_1 = arith.constant 0 : i32
    return %c0_i32, %c0_i32_0 : i32, i32
  }
  func.func @transform_4(%arg0: i32) -> (i32, i32) {
    %c0_i32 = arith.constant 0 : i32
    %c0_i32_0 = arith.constant 0 : i32
    %c0_i32_1 = arith.constant 0 : i32
    return %c0_i32, %c0_i32_0 : i32, i32
  }
  func.func @transform_5(%arg0: i32) -> (i32, i32) {
    %c0_i32 = arith.constant 0 : i32
    %c0_i32_0 = arith.constant 0 : i32
    %c0_i32_1 = arith.constant 0 : i32
    return %c0_i32, %c0_i32_0 : i32, i32
  }
  func.func @transform_6(%arg0: i32) -> (i32, i32) {
    %c0_i32 = arith.constant 0 : i32
    %c0_i32_0 = arith.constant 0 : i32
    %c0_i32_1 = arith.constant 0 : i32
    return %c0_i32, %c0_i32_0 : i32, i32
  }
  func.func @transform_7(%arg0: i32) -> (i32, i32) {
    %c0_i32 = arith.constant 0 : i32
    %c0_i32_0 = arith.constant 0 : i32
    return %arg0, %c0_i32 : i32, i32
  }
}

</mosaic_0001>

<bundles_post_ra>
// kernel: onnxable_policy_forward.1
= control target key start
LH: loop header
LB: loop body
LE: loop exit
PB: predicated region body
PF: predicated region fallthrough
CT: control target
= control target key end

     0   :  { %12 = vsyncpa [#allocation3], 0  ;;  %s2140_s0 = inlined_call_operand.vmem [shape: f32[8,16], index: 0, kind: input, shape index: {}]   ;;  %s2141_s1 = inlined_call_operand.vmem [shape: f32[16,32], index: 1, kind: input, shape index: {}]   ;;  %s2142_s2 = inlined_call_operand.vmem [shape: f32[1,32], index: 2, kind: input, shape index: {}]   ;;  %s2143_s3 = inlined_call_operand.hbm [shape: f32[32,32], index: 3, kind: input, shape index: {}]   ;;  %s2144_s4 = inlined_call_operand.vmem [shape: f32[1,32], index: 4, kind: input, shape index: {}]   ;;  %s2145_s5 = inlined_call_operand.hbm [shape: f32[32,128], index: 5, kind: input, shape index: {}]   ;;  %s2146_s6 = inlined_call_operand.vmem [shape: f32[1,128], index: 6, kind: input, shape index: {}]   ;;  %s2147_s7 = inlined_call_operand.vmem [shape: f32[8,128], index: 7, kind: output, shape index: {}]  }
   0x1   :  { %13 = vsyncpa [#allocation5], 0  ;;  %s1970_s24 = smov [#allocation2]   ;;  %s1922_s28 = scalar_lea.hbm %s2143_s3, 512 }
   0x2   :  { %s25_s25 = sshll.u32 %s1970_s24, 4  ;;  %p1923_p0 = scmp.ne.s32.totalorder %s2143_s3, %s1922_s28  ;;  %s26_s25 = int_to_ptr.vmem [resolvable:$true] %s25_s25 }
   0x3   :  { %p1926_p1 = scmp.lt.u32.totalorder %s1922_s28, %s2143_s3 }
   0x5   :  { %p1928_p2 = pnand %p1926_p1, %p1923_p0 }
   0x7   :  { %1931 = shalt.err (!%p1928_p2)
}
   0x8   :  { %s1932_s10 = scalar_lea.vmem %s26_s25, 512  ;;  %p1937_p4 = scmp.lt.s32.totalorder %s26_s25, %s26_s25 }
   0x9   :  { %p1933_p3 = scmp.ne.s32.totalorder %s26_s25, %s1932_s10  ;;  %p1938_p5 = scmp.lt.s32.totalorder %s1932_s10, %s1932_s10 }
   0xb   :  { %p1939_p6 = por %p1938_p5, %p1937_p4 }
   0xd   :  { %p1940_p7 = pnand %p1939_p6, %p1933_p3 }
   0xf   :  { %1943 = shalt.err (!%p1940_p7)
}
  0x10   :  { %s1971_s11 = smov 128   ;;  %s1972_s12 = smov 8  }
  0x11   :  { %31 = dma.hbm_to_vmem [thread:$0]  %s2143_s3, 512, %s26_s25, [#allocation3], %s1971_s11, %s1971_s11, %s1972_s12  }
  0x12   :  { %s1973_s15 = smov [#allocation4]   ;;  %s1944_s19 = scalar_lea.hbm %s2145_s5, 512 }
  0x13   :  { %s39_s16 = sshll.u32 %s1973_s15, 4  ;;  %p1945_p8 = scmp.ne.s32.totalorder %s2145_s5, %s1944_s19  ;;  %s40_s16 = int_to_ptr.vmem [resolvable:$true] %s39_s16 }
  0x14   :  { %p1948_p9 = scmp.lt.u32.totalorder %s1944_s19, %s2145_s5 }
  0x16   :  { %p1950_p10 = pnand %p1948_p9, %p1945_p8 }
  0x18   :  { %1953 = shalt.err (!%p1950_p10)
}
  0x19   :  { %s1954_s24 = scalar_lea.vmem %s40_s16, 512  ;;  %p1959_p12 = scmp.lt.s32.totalorder %s40_s16, %s40_s16 }
  0x1a   :  { %p1955_p11 = scmp.ne.s32.totalorder %s40_s16, %s1954_s24  ;;  %p1960_p13 = scmp.lt.s32.totalorder %s1954_s24, %s1954_s24 }
  0x1c   :  { %p1961_p0 = por %p1960_p13, %p1959_p12 }
  0x1e   :  { %p1962_p1 = pnand %p1961_p0, %p1955_p11 }
  0x20   :  { %1965 = shalt.err (!%p1962_p1)
}
  0x21   :  { %45 = dma.hbm_to_vmem [thread:$0]  %s2145_s5, 512, %s40_s16, [#allocation5], %s1971_s11, %s1971_s11, %s1972_s12  }
  0x22   :  { %1966 = dma.done.wait [#allocation3], 512  }
  0x23   :  { %1967 = vsyncadd [#allocation3], 4294966784 }
  0x24   :  { %1968 = dma.done.wait [#allocation5], 512  }
  0x25   :  { %1969 = vsyncadd [#allocation5], 4294966784  ;;  %v1974_v0 = vmov 0.0|0.0   ;;  %vm1975_vm0 = vmmov 0   ;;  %v1976_v1 = vmov 0.0   ;;  %vm64_vm1 = vcmask 130048  }
  0x26   :  { %1793 = vmatprep.subr.bf16.mxu0 %v1974_v0  ;;  %1627 = vmatprep.mubr.msk.f32.mxu0 %vm1975_vm0, %v1976_v1  ;;  %v55_v2 = vld [vmem:[%s2141_s1] sm:$0xff]  ;;  %v56_v3 = vld [vmem:[%s2141_s1 + $0x8] sm:$0xff]  ;;  %v530_v29 = vld [vmem:[#allocation2 + $0x10] sm:$0xff]  ;;  %vm539_vm2 = vcmask 261120  }
  0x27   :  { %1790 = vmatprep.subr.bf16.mxu1 %v1974_v0  ;;  %1620 = vmatprep.mubr.msk.f32.mxu1 %vm1975_vm0, %v1976_v1  ;;  %v54_v4 = vld [vmem:[%s2140_s0] sm:$0xff]  ;;  %v69_v5 = vand.u32 4294901760, %v55_v2  ;;  %v72_v6 = vand.u32 4294901760, %v56_v3  ;;  %v529_v26 = vld [vmem:[#allocation2 + $0x8] sm:$0xff]  ;;  %v531_v30 = vld [vmem:[#allocation2 + $0x18] sm:$0xff]  ;;  %v550_v34 = vand.u32 4294901760, %v530_v29 }
  0x28   :  { %v66_v7 = vsel %vm64_vm1, %v54_v4, 0  ;;  %v528_v25 = vld [vmem:[#allocation2] sm:$0xff]  ;;  %v547_v28 = vand.u32 4294901760, %v529_v26  ;;  %v553_v35 = vand.u32 4294901760, %v531_v30 }
  0x29   :  { %v135_v8 = vand.u32 4294901760, %v66_v7  ;;  %v147_v9 = vsub.f32 %v55_v2, %v69_v5  ;;  %v154_v10 = vsub.f32 %v56_v3, %v72_v6  ;;  %v1791_v11 = vpack.c.bf16 %v72_v6, %v69_v5  ;;  %v1535_v59 = vld [vmem:[%s2142_s2] ss:$0 sm:$0xff] }
  0x2a   :  { %v544_v27 = vand.u32 4294901760, %v528_v25  ;;  %v631_v33 = vsub.f32 %v529_v26, %v547_v28  ;;  %v638_v36 = vsub.f32 %v530_v29, %v550_v34  ;;  %v2078_v39 = vpack.c.bf16 %v553_v35, %v550_v34 }
  0x2b   :  { %v136_v12 = vsub.f32 %v66_v7, %v135_v8  ;;  %v148_v13 = vand.u32 4294901760, %v147_v9  ;;  %v155_v14 = vand.u32 4294901760, %v154_v10  ;;  %1792 = vmatpush3.bf16.msra.mxu1 %v1791_v11  ;;  %v1797_v23 = vpack.c.bf16 %v154_v10, %v147_v9 }
  0x2c   :  { %1808 = vmatprep.subr.bf16.mxu1 %v1974_v0  ;;  %v2074_v31 = vpack.c.bf16 %v547_v28, %v544_v27  ;;  %v624_v32 = vsub.f32 %v528_v25, %v544_v27  ;;  %v632_v38 = vand.u32 4294901760, %v631_v33  ;;  %v645_v40 = vsub.f32 %v531_v30, %v553_v35 }
  0x2d   :  { %v137_v15 = vand.u32 4294901760, %v136_v12  ;;  %v149_v16 = vsub.f32 %v147_v9, %v148_v13  ;;  %v156_v17 = vsub.f32 %v154_v10, %v155_v14  ;;  %v1803_v24 = vpack.c.bf16 %v155_v14, %v148_v13  ;;  %v1029_v9 = vld [vmem:[#allocation4] sm:$0xff]  ;;  %v1030_v10 = vld [vmem:[#allocation4 + $0x8] sm:$0xff] }
  0x2e   :  { %v625_v37 = vand.u32 4294901760, %v624_v32  ;;  %v633_v42 = vsub.f32 %v631_v33, %v632_v38  ;;  %v639_v45 = vand.u32 4294901760, %v638_v36  ;;  %v646_v46 = vand.u32 4294901760, %v645_v40 }
  0x2f   :  { %v138_v18 = vsub.f32 %v136_v12, %v137_v15  ;;  %v150_v19 = vand.u32 4294901760, %v149_v16  ;;  %v157_v20 = vand.u32 4294901760, %v156_v17  ;;  %v1821_v53 = vpack.c.bf16 %v631_v33, %v624_v32  ;;  %v1032_v16 = vld [vmem:[#allocation4 + $0x18] sm:$0xff] }
  0x30   :  { %v626_v41 = vsub.f32 %v624_v32, %v625_v37  ;;  %v634_v44 = vand.u32 4294901760, %v633_v42  ;;  %v640_v48 = vsub.f32 %v638_v36, %v639_v45  ;;  %v647_v49 = vsub.f32 %v645_v40, %v646_v46 }
  0x31   :  { %v139_v21 = vand.u32 4294901760, %v138_v18  ;;  %v1794_v22 = vpack.c.bf16 %v157_v20, %v150_v19  ;;  %v1824_v54 = vpack.c.bf16 %v645_v40, %v638_v36  ;;  %v1833_v55 = vpack.c.bf16 %v632_v38, %v625_v37 }
  0x32   :  { %v627_v43 = vand.u32 4294901760, %v626_v41  ;;  %v641_v50 = vand.u32 4294901760, %v640_v48  ;;  %v648_v51 = vand.u32 4294901760, %v647_v49  ;;  %v1836_v56 = vpack.c.bf16 %v646_v46, %v639_v45  ;;  %v1536_v41 = vld [vmem:[%s2144_s4] ss:$0 sm:$0xff] }
  0x33   :  { %1621 = vmatmul.mubr.f32.vlgmr.msra.gmra.mrb[0].mxu1 %v139_v21  ;;  %1795 = vmatpush3.bf16.msra.mxu0 %v1794_v22  ;;  %v1053_v20 = vand.u32 4294901760, %v1032_v16 }
  0x34   :  { %1666 = vmatprep.mubr.msk.f32.mxu1 %vm1975_vm0, %v1976_v1  ;;  %1796 = vmatprep.subr.bf16.mxu0 %v1974_v0  ;;  %v1815_v47 = vpack.c.bf16 %v634_v44, %v627_v43  ;;  %v1818_v52 = vpack.c.bf16 %v648_v51, %v641_v50 }
  0x35   :  { %1810 = vmatpush3.bf16.msra.mxu1 %v2074_v31 }
  0x36   :  { %1628 = vmatmul.mubr.f32.vlgmr.msra.gmra.mrb[0].mxu0 %v135_v8  ;;  %1811 = vmatprep.subr.bf16.mxu1 %v1974_v0 }
  0x37   :  { %1798 = vmatpush3.bf16.msra.mxu0 %v1797_v23  ;;  %1634 = vmatprep.mubr.msk.f32.mxu0 %vm1975_vm0, %v1976_v1 }
  0x38   :  { %1799 = vmatprep.subr.bf16.mxu0 %v1974_v0 }
  0x39   :  { %1813 = vmatpush3.bf16.msra.mxu1 %v2078_v39 }
  0x3a   :  { %1814 = vmatprep.subr.bf16.mxu1 %v1974_v0 }
  0x3e   :  { %1635 = vmatmul.mubr.f32.vlgmr.msra.gmra.mrb[0].mxu0 %v136_v12  ;;  %v1047_v12 = vand.u32 4294901760, %v1030_v10 }
  0x3f   :  { %1801 = vmatpush3.bf16.msra.mxu0 %v1791_v11  ;;  %1641 = vmatprep.mubr.msk.f32.mxu0 %vm1975_vm0, %v1976_v1 }
  0x40   :  { %1802 = vmatprep.subr.bf16.mxu0 %v1974_v0  ;;  %v1131_v14 = vsub.f32 %v1030_v10, %v1047_v12 }
  0x42   :  { %v1132_v18 = vand.u32 4294901760, %v1131_v14 }
  0x44   :  { %v1133_v22 = vsub.f32 %v1131_v14, %v1132_v18 }
  0x46   :  { %1642 = vmatmul.mubr.f32.vlgmr.msra.gmra.mrb[0].mxu0 %v137_v15  ;;  %v1031_v15 = vld [vmem:[#allocation4 + $0x10] sm:$0xff]  ;;  %v1134_v26 = vand.u32 4294901760, %v1133_v22 }
  0x47   :  { %1804 = vmatpush3.bf16.msra.mxu0 %v1803_v24  ;;  %1648 = vmatprep.mubr.msk.f32.mxu0 %vm1975_vm0, %v1976_v1  ;;  %v1050_v19 = vand.u32 4294901760, %v1031_v15  ;;  %v1145_v24 = vsub.f32 %v1032_v16, %v1053_v20 }
  0x48   :  { %1805 = vmatprep.subr.bf16.mxu0 %v1974_v0 }
  0x49   :  { %v1138_v23 = vsub.f32 %v1031_v15, %v1050_v19  ;;  %v1146_v28 = vand.u32 4294901760, %v1145_v24  ;;  %v1848_v37 = vpack.c.bf16 %v1053_v20, %v1050_v19 }
  0x4b   :  { %v1139_v27 = vand.u32 4294901760, %v1138_v23  ;;  %v1860_v38 = vpack.c.bf16 %v1145_v24, %v1138_v23 }
  0x4d   :  { %v1140_v30 = vsub.f32 %v1138_v23, %v1139_v27  ;;  %v1872_v40 = vpack.c.bf16 %v1146_v28, %v1139_v27 }
  0x4e   :  { %1649 = vmatmul.mubr.f32.vlgmr.msra.gmra.mrb[0].mxu0 %v135_v8 }
  0x4f   :  { %1807 = vmatpush3.bf16.msra.mxu0 %v1791_v11  ;;  %1655 = vmatprep.mubr.msk.f32.mxu0 %vm1975_vm0, %v1976_v1  ;;  %v1044_v11 = vand.u32 4294901760, %v1029_v9  ;;  %v1141_v32 = vand.u32 4294901760, %v1140_v30 }
  0x50   :  { %1850 = vmatprep.subr.bf16.mxu0 %v1974_v0 }
  0x51   :  { %v1124_v13 = vsub.f32 %v1029_v9, %v1044_v11  ;;  %v1845_v35 = vpack.c.bf16 %v1047_v12, %v1044_v11 }
  0x53   :  { %v1125_v17 = vand.u32 4294901760, %v1124_v13  ;;  %v1857_v36 = vpack.c.bf16 %v1131_v14, %v1124_v13 }
  0x55   :  { %v1126_v21 = vsub.f32 %v1124_v13, %v1125_v17 }
  0x56   :  { %1656 = vmatmul.mubr.f32.vlgmr.msra.gmra.mrb[0].mxu0 %v135_v8 }
  0x57   :  { %1743 = vmatprep.mubr.msk.f32.mxu0 %vm1975_vm0, %v1976_v1  ;;  %v1127_v25 = vand.u32 4294901760, %v1126_v21 }
  0x59   :  { %v1851_v29 = vpack.c.bf16 %v1134_v26, %v1127_v25 }
  0x5b   :  { %1852 = vmatpush3.bf16.msra.mxu0 %v1851_v29 }
  0x5c   :  { %1853 = vmatprep.subr.bf16.mxu0 %v1974_v0 }
 0x106   :  { %v141_v57 = vpop.f32.mrb[0].mxu1 }
 0x107   :  { %v1622_v58 = vpop.f32.mrb[1].mxu1  ;;  %v142_v60 = vadd.f32 %v1535_v59, %v141_v57 }
 0x129   :  { %v523_v61 = vpop.f32.mrb[0].mxu0 }
 0x12a   :  { %v1881_v62 = vadd.f32 %v523_v61, %v142_v60  ;;  %v1657_v63 = vpop.f32.mrb[1].mxu0 }
 0x12c   :  { %1918 = vtanh.f32 %v1881_v62 }
 0x136   :  { %v1919_v2 = vpop.eup %1918 }
 0x137   :  { %v541_v3 = vsel %vm539_vm2, %v1919_v2, 0 }
 0x138   :  { %v612_v4 = vand.u32 4294901760, %v541_v3 }
 0x13a   :  { %v613_v5 = vsub.f32 %v541_v3, %v612_v4 }
 0x13c   :  { %v614_v6 = vand.u32 4294901760, %v613_v5 }
 0x13e   :  { %v615_v7 = vsub.f32 %v613_v5, %v614_v6 }
 0x140   :  { %v616_v8 = vand.u32 4294901760, %v615_v7 }
 0x142   :  { %1667 = vmatmul.mubr.f32.vlgmr.msra.gmra.mrb[2].mxu1 %v616_v8 }
 0x143   :  { %1816 = vmatpush3.bf16.msra.mxu1 %v1815_v47  ;;  %1677 = vmatprep.mubr.msk.f32.mxu1 %vm1975_vm0, %v1976_v1 }
 0x144   :  { %1817 = vmatprep.subr.bf16.mxu1 %v1974_v0 }
 0x147   :  { %1819 = vmatpush3.bf16.msra.mxu1 %v1818_v52 }
 0x148   :  { %1820 = vmatprep.subr.bf16.mxu1 %v1974_v0 }
 0x14a   :  { %1678 = vmatmul.mubr.f32.vlgmr.msra.gmra.mrb[2].mxu1 %v612_v4 }
 0x14b   :  { %1822 = vmatpush3.bf16.msra.mxu1 %v1821_v53  ;;  %1688 = vmatprep.mubr.msk.f32.mxu1 %vm1975_vm0, %v1976_v1 }
 0x14c   :  { %1823 = vmatprep.subr.bf16.mxu1 %v1974_v0 }
 0x14f   :  { %1825 = vmatpush3.bf16.msra.mxu1 %v1824_v54  ;;  %v1537_v54 = vld [vmem:[%s2146_s6] ss:$0 sm:$0xff] }
 0x150   :  { %1826 = vmatprep.subr.bf16.mxu1 %v1974_v0 }
 0x152   :  { %1689 = vmatmul.mubr.f32.vlgmr.msra.gmra.mrb[2].mxu1 %v613_v5 }
 0x153   :  { %1828 = vmatpush3.bf16.msra.mxu1 %v2074_v31  ;;  %1699 = vmatprep.mubr.msk.f32.mxu1 %vm1975_vm0, %v1976_v1 }
 0x154   :  { %1829 = vmatprep.subr.bf16.mxu1 %v1974_v0 }
 0x157   :  { %1831 = vmatpush3.bf16.msra.mxu1 %v2078_v39 }
 0x158   :  { %1832 = vmatprep.subr.bf16.mxu1 %v1974_v0 }
 0x15a   :  { %1700 = vmatmul.mubr.f32.vlgmr.msra.gmra.mrb[2].mxu1 %v614_v6 }
 0x15b   :  { %1834 = vmatpush3.bf16.msra.mxu1 %v1833_v55  ;;  %1710 = vmatprep.mubr.msk.f32.mxu1 %vm1975_vm0, %v1976_v1 }
 0x15c   :  { %1835 = vmatprep.subr.bf16.mxu1 %v1974_v0 }
 0x15f   :  { %1837 = vmatpush3.bf16.msra.mxu1 %v1836_v56 }
 0x160   :  { %1838 = vmatprep.subr.bf16.mxu1 %v1974_v0 }
 0x162   :  { %1711 = vmatmul.mubr.f32.vlgmr.msra.gmra.mrb[2].mxu1 %v612_v4 }
 0x163   :  { %1840 = vmatpush3.bf16.msra.mxu1 %v2074_v31  ;;  %1721 = vmatprep.mubr.msk.f32.mxu1 %vm1975_vm0, %v1976_v1  ;;  %v1147_v31 = vsub.f32 %v1145_v24, %v1146_v28 }
 0x164   :  { %1841 = vmatprep.subr.bf16.mxu1 %v1974_v0 }
 0x165   :  { %v1148_v33 = vand.u32 4294901760, %v1147_v31 }
 0x167   :  { %1843 = vmatpush3.bf16.msra.mxu1 %v2078_v39  ;;  %v1854_v34 = vpack.c.bf16 %v1148_v33, %v1141_v32  ;;  %v1869_v39 = vpack.c.bf16 %v1132_v18, %v1125_v17 }
 0x168   :  { %1844 = vmatprep.subr.bf16.mxu1 %v1974_v0 }
 0x169   :  { %1855 = vmatpush3.bf16.msra.mxu0 %v1854_v34 }
 0x16a   :  { %1722 = vmatmul.mubr.f32.vlgmr.msra.gmra.mrb[2].mxu1 %v612_v4  ;;  %1856 = vmatprep.subr.bf16.mxu0 %v1974_v0 }
 0x16b   :  { %1732 = vmatprep.mubr.msk.f32.mxu1 %vm1975_vm0, %v1976_v1  ;;  %1846 = vmatpush3.bf16.msra.mxu1 %v1845_v35 }
 0x16c   :  { %1847 = vmatprep.subr.bf16.mxu1 %v1974_v0 }
 0x16f   :  { %1849 = vmatpush3.bf16.msra.mxu1 %v1848_v37 }
 0x23d   :  { %v1024_v42 = vpop.f32.mrb[2].mxu1 }
 0x23e   :  { %v1882_v43 = vadd.f32 %v1536_v41, %v1024_v42  ;;  %v1723_v44 = vpop.f32.mrb[3].mxu1 }
 0x240   :  { %1920 = vtanh.f32 %v1882_v43 }
 0x24a   :  { %v1921_v45 = vpop.eup %1920 }
 0x24b   :  { %v1041_v46 = vsel %vm539_vm2, %v1921_v45, 0 }
 0x24c   :  { %v1112_v47 = vand.u32 4294901760, %v1041_v46 }
 0x24e   :  { %v1113_v48 = vsub.f32 %v1041_v46, %v1112_v47  ;;  %1744 = vmatmul.mubr.f32.vlgmr.msra.gmra.mrb[2].mxu0 %v1112_v47 }
 0x24f   :  { %1858 = vmatpush3.bf16.msra.mxu0 %v1857_v36  ;;  %1754 = vmatprep.mubr.msk.f32.mxu0 %vm1975_vm0, %v1976_v1 }
 0x250   :  { %1859 = vmatprep.subr.bf16.mxu0 %v1974_v0  ;;  %v1114_v49 = vand.u32 4294901760, %v1113_v48 }
 0x252   :  { %v1115_v50 = vsub.f32 %v1113_v48, %v1114_v49 }
 0x253   :  { %1861 = vmatpush3.bf16.msra.mxu0 %v1860_v38 }
 0x254   :  { %v1116_v51 = vand.u32 4294901760, %v1115_v50  ;;  %1862 = vmatprep.subr.bf16.mxu0 %v1974_v0 }
 0x256   :  { %1733 = vmatmul.mubr.f32.vlgmr.msra.gmra.mrb[4].mxu1 %v1116_v51  ;;  %1755 = vmatmul.mubr.f32.vlgmr.msra.gmra.mrb[2].mxu0 %v1113_v48 }
 0x257   :  { %1864 = vmatpush3.bf16.msra.mxu0 %v1845_v35  ;;  %1765 = vmatprep.mubr.msk.f32.mxu0 %vm1975_vm0, %v1976_v1 }
 0x258   :  { %1865 = vmatprep.subr.bf16.mxu0 %v1974_v0 }
 0x25b   :  { %1867 = vmatpush3.bf16.msra.mxu0 %v1848_v37 }
 0x25c   :  { %1868 = vmatprep.subr.bf16.mxu0 %v1974_v0 }
 0x25e   :  { %1766 = vmatmul.mubr.f32.vlgmr.msra.gmra.mrb[2].mxu0 %v1114_v49 }
 0x25f   :  { %1870 = vmatpush3.bf16.msra.mxu0 %v1869_v39  ;;  %1776 = vmatprep.mubr.msk.f32.mxu0 %vm1975_vm0, %v1976_v1 }
 0x260   :  { %1871 = vmatprep.subr.bf16.mxu0 %v1974_v0 }
 0x263   :  { %1873 = vmatpush3.bf16.msra.mxu0 %v1872_v40 }
 0x264   :  { %1874 = vmatprep.subr.bf16.mxu0 %v1974_v0 }
 0x266   :  { %1777 = vmatmul.mubr.f32.vlgmr.msra.gmra.mrb[2].mxu0 %v1112_v47 }
 0x267   :  { %1876 = vmatpush3.bf16.msra.mxu0 %v1845_v35  ;;  %1787 = vmatprep.mubr.msk.f32.mxu0 %vm1975_vm0, %v1976_v1 }
 0x268   :  { %1877 = vmatprep.subr.bf16.mxu0 %v1974_v0 }
 0x26b   :  { %1879 = vmatpush3.bf16.msra.mxu0 %v1848_v37 }
 0x26e   :  { %1788 = vmatmul.mubr.f32.vlgmr.msra.gmra.mrb[2].mxu0 %v1112_v47 }
 0x329   :  { %v1118_v52 = vpop.f32.mrb[4].mxu1 }
 0x32a   :  { %v1734_v53 = vpop.f32.mrb[5].mxu1  ;;  %v1119_v55 = vadd.f32 %v1537_v54, %v1118_v52 }
 0x341   :  { %v1524_v56 = vpop.f32.mrb[2].mxu0 }
 0x342   :  { %v1884_v57 = vadd.f32 %v1524_v56, %v1119_v55  ;;  %v1789_v58 = vpop.f32.mrb[3].mxu0 }
 0x344   :  { %1528 = vst [vmem:[%s2147_s7] sm:$0xff] %v1884_v57 }
 0x345   :  { %1533 = vsyncpa [#allocation3], 1 }
 0x346   :  { %1534 = vsyncpa [#allocation5], 1 }

</bundles_post_ra>
